<compile_context>
chip_gen: v7x
topology: tpu7x:2x2x1
jax: 0.10.0
libtpu: 0.0.40
codegen_flags: <defaults>
</compile_context>

<pallas_src>
import functools

import jax
import jax.numpy as jnp
from jax.experimental import pallas as pl
from jax.experimental.pallas import tpu as pltpu

SMOOTH = 1e-6
NUM_CLASSES = 3


# --------------------------------------------------------------------------- #
# Tiling plan                                                                  #
# --------------------------------------------------------------------------- #
def _vmem_budget():
    """(double-buffered input budget, scoped vmem limit) adapted to chip VMEM."""
    cap = 64 * 1024 * 1024
    try:
        info = pltpu.get_tpu_info()
        cap = int(getattr(info, "vmem_capacity_bytes", cap))
    except Exception:
        pass
    if cap >= 100 * 1024 * 1024:
        # v5e / v6e: 128 MiB physical VMEM -> bigger tiles, fewer grid steps.
        return 24 * 1024 * 1024, 96 * 1024 * 1024
    # v7x (64 MiB physical / 32 MiB scoped): keep headroom for full-tile temps.
    return 8 * 1024 * 1024, 32 * 1024 * 1024


def _round_up(x, m):
    return ((x + m - 1) // m) * m


def _plan(rows, lanes, batch, preds_itemsize, tgt_itemsize):
    """Returns (row_tile, n_parallel_splits, tiles_per_split, padded_rows, vmem_limit)."""
    # Sublane multiple required by the narrowest input dtype: f32->8, bf16->16, i8->32.
    row_mult = max(8, 32 // preds_itemsize, 32 // tgt_itemsize)
    in_budget, vmem_limit = _vmem_budget()
    bytes_per_row = (NUM_CLASSES * preds_itemsize + tgt_itemsize) * lanes
    max_th = max(row_mult, in_budget // (2 * bytes_per_row))       # double-buffered
    max_th = max(row_mult, (max_th // row_mult) * row_mult)
    rows_up = _round_up(max(rows, 1), row_mult)
    th = min(max_th, rows_up)
    n_tiles = -(-rows_up // th)
    if batch == 1 and n_tiles == 1 and rows_up >= 2 * row_mult:
        # Engage the second TensorCore (v7x) even for batch-1 inputs.
        th = _round_up(-(-rows_up // 2), row_mult)
        n_tiles = -(-rows_up // th)
    n_par = 2 if (n_tiles >= 2 and n_tiles % 2 == 0) else 1
    return th, n_par, n_tiles // n_par, n_tiles * th, vmem_limit


# --------------------------------------------------------------------------- #
# Kernel                                                                       #
# --------------------------------------------------------------------------- #
def _partials_kernel(preds_ref, tgt_ref, out_ref, *, th, lanes):
    """Accumulate, per (batch, lane), the 5 weighted partials
         rows  0- 7 : sum(wm)
         rows  8-15 : sum(wm * p[target])
         rows 16-23 : sum(wm * sum_c p)
         rows 24-31 : sum(wm * sum_c p^2)
         rows 32-39 : count(target == 2)
       each kept as 8 sublane partials; the final 8->1 reduce is in the wrapper.
    """
    @pl.when(pl.program_id(2) == 0)
    def _init():
        out_ref[...] = jnp.zeros_like(out_ref)

    p0 = preds_ref[0].astype(jnp.float32)        # [th, lanes]
    p1 = preds_ref[1].astype(jnp.float32)
    p2 = preds_ref[2].astype(jnp.float32)
    t = tgt_ref[...]

    is1 = t == 1
    is2 = t == 2
    is2f = is2.astype(jnp.float32)

    # Sum-of-wheres exactly like the PyTorch reference; padded rows use the
    # sentinel target value NUM_CLASSES -> wm == 0 -> zero contribution.
    wm = (jnp.where(t == 0, 1.0, 0.0)
          + jnp.where(is1, 5.0, 0.0)
          + jnp.where(is2, 50.0, 0.0))
    psel = jnp.where(is2, p2, jnp.where(is1, p1, p0))        # p[target]
    s1 = p0 + p1 + p2                                        # sum_c p
    s2 = p0 * p0 + p1 * p1 + p2 * p2                         # sum_c p^2

    def fold8(x):   # [th, lanes] -> [8, lanes]; VPU adds across vregs, no XLU
        return jnp.sum(x.reshape(th // 8, 8, lanes), axis=0)

    out_ref[0:8, :] += fold8(wm)
    out_ref[8:16, :] += fold8(wm * psel)
    out_ref[16:24, :] += fold8(wm * s1)
    out_ref[24:32, :] += fold8(wm * s2)
    out_ref[32:40, :] += fold8(is2f)


# --------------------------------------------------------------------------- #
# Wrapper                                                                      #
# --------------------------------------------------------------------------- #
def tanimoto_loss(preds, targets, smooth=SMOOTH):
    B, C, H, W = preds.shape
    assert C == NUM_CLASSES
    assert targets.shape == (B, H, W)

    p_is = preds.dtype.itemsize
    t_is = targets.dtype.itemsize

    # Lane-dense layout: flatten (H, W) to rows of 128 lanes when W < 128 and
    # W | 128 (lane l then maps to column w = l mod W, so per-w sums are exact).
    flat = (W < 128) and (128 % W == 0)
    if flat:
        lanes, fold = 128, 128 // W
        rows = -(-(H * W) // 128)
    else:
        lanes, fold = W, 1
        rows = H
        # TODO(synk): W neither a multiple of 128 nor a divisor of it keeps a
        # partially masked lane axis (correct, just not lane-dense).

    th, n_par, n_rt, rows_pad, vmem_limit = _plan(rows, lanes, B, p_is, t_is)

    if flat:
        total_px = rows_pad * 128
        p_in = preds.reshape(B, C, H * W)
        t_in = targets.reshape(B, H * W)
        if total_px > H * W:
            pad = total_px - H * W
            p_in = jnp.pad(p_in, ((0, 0), (0, 0), (0, pad)))
            t_in = jnp.pad(t_in, ((0, 0), (0, pad)), constant_values=NUM_CLASSES)
        p_in = p_in.reshape(B, C, rows_pad, 128)
        t_in = t_in.reshape(B, rows_pad, 128)
    else:
        p_in, t_in = preds, targets
        if rows_pad > H:
            pad = rows_pad - H
            p_in = jnp.pad(p_in, ((0, 0), (0, 0), (0, pad), (0, 0)))
            t_in = jnp.pad(t_in, ((0, 0), (0, pad), (0, 0)),
                           constant_values=NUM_CLASSES)

    kernel = functools.partial(_partials_kernel, th=th, lanes=lanes)

    out = pl.pallas_call(
        kernel,
        out_shape=jax.ShapeDtypeStruct((n_par, B, 5 * 8, lanes), jnp.float32),
        grid_spec=pltpu.PrefetchScalarGridSpec(
            num_scalar_prefetch=0,
            grid=(n_par, B, n_rt),
            in_specs=[
                pl.BlockSpec((pl.Squeezed(), C, th, lanes),
                             lambda p, b, r: (b, 0, p * n_rt + r, 0)),
                pl.BlockSpec((pl.Squeezed(), th, lanes),
                             lambda p, b, r: (b, p * n_rt + r, 0)),
            ],
            out_specs=pl.BlockSpec((pl.Squeezed(), pl.Squeezed(), 5 * 8, lanes),
                                   lambda p, b, r: (p, b, 0, 0)),
        ),
        compiler_params=pltpu.CompilerParams(
            dimension_semantics=("parallel", "parallel", "arbitrary"),
            vmem_limit_bytes=vmem_limit,
        ),
    )(p_in, t_in)

    # Tiny reduction tail in plain JAX (exact: all partials are linear in wm).
    acc = out.sum(axis=0).reshape(B, 5, 8, lanes).sum(axis=2)      # [B, 5, lanes]
    if fold > 1:
        acc = acc.reshape(B, 5, fold, W).sum(axis=2)               # [B, 5, W]

    swm = acc[:, 0, :]      # sum(wm)                per (b, w)
    num1 = acc[:, 1, :]     # sum(wm * p_sel)
    a1 = acc[:, 2, :]       # sum(wm * S1)
    a2 = acc[:, 3, :]       # sum(wm * S2)
    count2 = jnp.sum(acc[:, 4, :])                                 # global #(t==2)

    # wli = wm * count2^2 * 5; the scalar factor distributes over the sums.
    factor = 5.0 * count2 * count2
    den1 = a2 + swm - num1                   # sum(wm * (S2 + 1 - p_sel))
    num2 = 2.0 * swm - a1 + num1             # sum(wm * (2 - S1 + p_sel))
    den2 = 3.0 * swm - a1 + a2 - num1        # sum(wm * (3 - S1 + S2 - p_sel))

    loss1 = 1.0 - jnp.mean((factor * num1 + smooth) / (factor * den1 + smooth))
    loss2 = 1.0 - jnp.mean((factor * num2 + smooth) / (factor * den2 + smooth))
    return 0.5 * (loss1 + loss2)


# --------------------------------------------------------------------------- #
# Pure-JAX reference (direct transcription of the PyTorch module)              #
# --------------------------------------------------------------------------- #
def _reference_loss(preds, targets, smooth=SMOOTH):
    tf = targets.astype(jnp.float32)
    wm = (jnp.where(tf == 0, 1.0, 0.0)
          + jnp.where(tf == 1, 5.0, 0.0)
          + jnp.where(tf == 2, 50.0, 0.0))
    wli = wm * (jnp.sum(targets == 2).astype(jnp.float32) ** 2) * 5.0
    onehot = jax.nn.one_hot(targets, NUM_CLASSES, dtype=jnp.float32)
    onehot = jnp.transpose(onehot, (0, 3, 1, 2))                   # NCHW

    def tani(p, t):
        sum_sq = jnp.sum(p * p + t * t, axis=1)
        prod_sum = jnp.sum(p * t, axis=1)
        spl = jnp.sum(wli * prod_sum, axis=1)
        dsl = jnp.sum(wli * (sum_sq - prod_sum), axis=1)
        return 1.0 - jnp.mean((spl + smooth) / (dsl + smooth))

    l1 = tani(preds, onehot)
    l2 = tani(1.0 - preds, 1.0 - onehot)
    return (l1 + l2) / 2.0


if __name__ == "__main__":
    key = jax.random.PRNGKey(0)
    kp, kt = jax.random.split(key)
    B, C, H, W = 2, NUM_CLASSES, 16, 16

    logits = jax.random.normal(kp, (B, C, H, W), dtype=jnp.float32)
    preds = jax.nn.softmax(logits, axis=1)                         # NCHW predictions
    targets = jax.random.randint(kt, (B, H, W), 0, NUM_CLASSES, dtype=jnp.int32)

    loss = jax.block_until_ready(tanimoto_loss(preds, targets))
    ref = jax.block_until_ready(_reference_loss(preds, targets))
    assert jnp.allclose(loss, ref, rtol=1e-3, atol=1e-5), (loss, ref)

    print("KERNEL_OK")
</pallas_src>

<mosaic_0001>
module attributes {stable_mosaic.version = 11 : i64} {
  func.func @_partials_kernel(%arg0: i32, %arg1: i32, %arg2: i32, %arg3: memref<1x3x8x128xf32, #tpu.memory_space<vmem>>, %arg4: memref<1x8x128xi32, #tpu.memory_space<vmem>>, %arg5: memref<1x1x40x128xf32, #tpu.memory_space<vmem>>) attributes {dimension_semantics = [#tpu.dimension_semantics<parallel>, #tpu.dimension_semantics<parallel>, #tpu.dimension_semantics<arbitrary>], iteration_bounds = array<i64: 1, 2, 1>, scalar_prefetch = 0 : i64, scratch_operands = 0 : i64, tpu.core_type = #tpu.core_type<tc>, window_params = [{transform_indices = @transform_0, window_bounds = array<i64: 1, 3, 8, 128>}, {transform_indices = @transform_1, window_bounds = array<i64: 1, 8, 128>}, {transform_indices = @transform_2, window_bounds = array<i64: 1, 1, 40, 128>}]} {
    %c0_i32 = arith.constant 0 : i32
    %0 = arith.cmpi eq, %arg2, %c0_i32 : i32
    %1 = arith.extui %0 : i1 to i32
    %c0_i32_0 = arith.constant 0 : i32
    %2 = arith.cmpi ne, %1, %c0_i32_0 : i32
    scf.if %2 {
      %cst_60 = arith.constant 0.000000e+00 : f32
      %82 = vector.broadcast %cst_60 : f32 to vector<40x128xf32>
      %c0_61 = arith.constant 0 : index
      %c0_62 = arith.constant 0 : index
      %c0_63 = arith.constant 0 : index
      %c0_64 = arith.constant 0 : index
      %83 = vector.load %arg5[%c0_61, %c0_62, %c0_63, %c0_64] : memref<1x1x40x128xf32, #tpu.memory_space<vmem>>, vector<1x1x40x128xf32>
      %84 = vector.shape_cast %83 : vector<1x1x40x128xf32> to vector<40x128xf32>
      %85 = vector.shape_cast %82 : vector<40x128xf32> to vector<1x1x40x128xf32>
      tpu.vector_store %arg5[%c0_61, %c0_62, %c0_63, %c0_64], %85 {strides = array<i32>} : memref<1x1x40x128xf32, #tpu.memory_space<vmem>>, vector<1x1x40x128xf32>,
    } else {
    }
    %c0 = arith.constant 0 : index
    %c0_1 = arith.constant 0 : index
    %c0_2 = arith.constant 0 : index
    %c0_3 = arith.constant 0 : index
    %3 = vector.load %arg3[%c0, %c0_1, %c0_2, %c0_3] : memref<1x3x8x128xf32, #tpu.memory_space<vmem>>, vector<1x1x8x128xf32>
    %4 = vector.shape_cast %3 : vector<1x1x8x128xf32> to vector<8x128xf32>
    %c0_4 = arith.constant 0 : index
    %c1 = arith.constant 1 : index
    %c0_5 = arith.constant 0 : index
    %c0_6 = arith.constant 0 : index
    %5 = vector.load %arg3[%c0_4, %c1, %c0_5, %c0_6] : memref<1x3x8x128xf32, #tpu.memory_space<vmem>>, vector<1x1x8x128xf32>
    %6 = vector.shape_cast %5 : vector<1x1x8x128xf32> to vector<8x128xf32>
    %c0_7 = arith.constant 0 : index
    %c2 = arith.constant 2 : index
    %c0_8 = arith.constant 0 : index
    %c0_9 = arith.constant 0 : index
    %7 = vector.load %arg3[%c0_7, %c2, %c0_8, %c0_9] : memref<1x3x8x128xf32, #tpu.memory_space<vmem>>, vector<1x1x8x128xf32>
    %8 = vector.shape_cast %7 : vector<1x1x8x128xf32> to vector<8x128xf32>
    %c0_10 = arith.constant 0 : index
    %c0_11 = arith.constant 0 : index
    %c0_12 = arith.constant 0 : index
    %9 = vector.load %arg4[%c0_10, %c0_11, %c0_12] : memref<1x8x128xi32, #tpu.memory_space<vmem>>, vector<1x8x128xi32>
    %10 = vector.shape_cast %9 : vector<1x8x128xi32> to vector<8x128xi32>
    %c1_i32 = arith.constant 1 : i32
    %11 = vector.broadcast %c1_i32 : i32 to vector<8x128xi32>
    %12 = arith.cmpi eq, %10, %11 : vector<8x128xi32>
    %c2_i32 = arith.constant 2 : i32
    %13 = vector.broadcast %c2_i32 : i32 to vector<8x128xi32>
    %14 = arith.cmpi eq, %10, %13 : vector<8x128xi32>
    %15 = arith.extui %14 : vector<8x128xi1> to vector<8x128xi32>
    %16 = arith.sitofp %15 : vector<8x128xi32> to vector<8x128xf32>
    %c0_i32_13 = arith.constant 0 : i32
    %17 = vector.broadcast %c0_i32_13 : i32 to vector<8x128xi32>
    %18 = arith.cmpi eq, %10, %17 : vector<8x128xi32>
    %cst = arith.constant 1.000000e+00 : f32
    %cst_14 = arith.constant 0.000000e+00 : f32
    %19 = vector.broadcast %cst : f32 to vector<8x128xf32>
    %20 = vector.broadcast %cst_14 : f32 to vector<8x128xf32>
    %21 = arith.select %18, %19, %20 : vector<8x128xi1>, vector<8x128xf32>
    %cst_15 = arith.constant 5.000000e+00 : f32
    %cst_16 = arith.constant 0.000000e+00 : f32
    %22 = vector.broadcast %cst_15 : f32 to vector<8x128xf32>
    %23 = vector.broadcast %cst_16 : f32 to vector<8x128xf32>
    %24 = arith.select %12, %22, %23 : vector<8x128xi1>, vector<8x128xf32>
    %25 = arith.addf %21, %24 : vector<8x128xf32>
    %cst_17 = arith.constant 5.000000e+01 : f32
    %cst_18 = arith.constant 0.000000e+00 : f32
    %26 = vector.broadcast %cst_17 : f32 to vector<8x128xf32>
    %27 = vector.broadcast %cst_18 : f32 to vector<8x128xf32>
    %28 = arith.select %14, %26, %27 : vector<8x128xi1>, vector<8x128xf32>
    %29 = arith.addf %25, %28 : vector<8x128xf32>
    %30 = arith.select %12, %6, %4 : vector<8x128xi1>, vector<8x128xf32>
    %31 = arith.select %14, %8, %30 : vector<8x128xi1>, vector<8x128xf32>
    %32 = arith.addf %4, %6 : vector<8x128xf32>
    %33 = arith.addf %32, %8 : vector<8x128xf32>
    %34 = arith.mulf %4, %4 : vector<8x128xf32>
    %35 = arith.mulf %6, %6 : vector<8x128xf32>
    %36 = arith.addf %34, %35 : vector<8x128xf32>
    %37 = arith.mulf %8, %8 : vector<8x128xf32>
    %38 = arith.addf %36, %37 : vector<8x128xf32>
    %c0_19 = arith.constant 0 : index
    %c0_20 = arith.constant 0 : index
    %c0_21 = arith.constant 0 : index
    %c0_22 = arith.constant 0 : index
    %39 = vector.load %arg5[%c0_19, %c0_20, %c0_21, %c0_22] : memref<1x1x40x128xf32, #tpu.memory_space<vmem>>, vector<1x1x8x128xf32>
    %40 = vector.shape_cast %39 : vector<1x1x8x128xf32> to vector<8x128xf32>
    %41 = vector.shape_cast %29 : vector<8x128xf32> to vector<1x8x128xf32>
    %cst_23 = arith.constant dense<0.000000e+00> : vector<8x128xf32>
    %42 = vector.multi_reduction <add>, %41, %cst_23 [0] : vector<1x8x128xf32> to vector<8x128xf32>
    %43 = arith.addf %40, %42 : vector<8x128xf32>
    %c0_24 = arith.constant 0 : index
    %c0_25 = arith.constant 0 : index
    %c0_26 = arith.constant 0 : index
    %c0_27 = arith.constant 0 : index
    %44 = vector.load %arg5[%c0_24, %c0_25, %c0_26, %c0_27] : memref<1x1x40x128xf32, #tpu.memory_space<vmem>>, vector<1x1x8x128xf32>
    %45 = vector.shape_cast %44 : vector<1x1x8x128xf32> to vector<8x128xf32>
    %46 = vector.shape_cast %43 : vector<8x128xf32> to vector<1x1x8x128xf32>
    tpu.vector_store %arg5[%c0_24, %c0_25, %c0_26, %c0_27], %46 {strides = array<i32>} : memref<1x1x40x128xf32, #tpu.memory_space<vmem>>, vector<1x1x8x128xf32>,
    %c0_28 = arith.constant 0 : index
    %c0_29 = arith.constant 0 : index
    %c8 = arith.constant 8 : index
    %c0_30 = arith.constant 0 : index
    %47 = vector.load %arg5[%c0_28, %c0_29, %c8, %c0_30] : memref<1x1x40x128xf32, #tpu.memory_space<vmem>>, vector<1x1x8x128xf32>
    %48 = vector.shape_cast %47 : vector<1x1x8x128xf32> to vector<8x128xf32>
    %49 = arith.mulf %29, %31 : vector<8x128xf32>
    %50 = vector.shape_cast %49 : vector<8x128xf32> to vector<1x8x128xf32>
    %cst_31 = arith.constant dense<0.000000e+00> : vector<8x128xf32>
    %51 = vector.multi_reduction <add>, %50, %cst_31 [0] : vector<1x8x128xf32> to vector<8x128xf32>
    %52 = arith.addf %48, %51 : vector<8x128xf32>
    %c0_32 = arith.constant 0 : index
    %c0_33 = arith.constant 0 : index
    %c8_34 = arith.constant 8 : index
    %c0_35 = arith.constant 0 : index
    %53 = vector.load %arg5[%c0_32, %c0_33, %c8_34, %c0_35] : memref<1x1x40x128xf32, #tpu.memory_space<vmem>>, vector<1x1x8x128xf32>
    %54 = vector.shape_cast %53 : vector<1x1x8x128xf32> to vector<8x128xf32>
    %55 = vector.shape_cast %52 : vector<8x128xf32> to vector<1x1x8x128xf32>
    tpu.vector_store %arg5[%c0_32, %c0_33, %c8_34, %c0_35], %55 {strides = array<i32>} : memref<1x1x40x128xf32, #tpu.memory_space<vmem>>, vector<1x1x8x128xf32>,
    %c0_36 = arith.constant 0 : index
    %c0_37 = arith.constant 0 : index
    %c16 = arith.constant 16 : index
    %c0_38 = arith.constant 0 : index
    %56 = vector.load %arg5[%c0_36, %c0_37, %c16, %c0_38] : memref<1x1x40x128xf32, #tpu.memory_space<vmem>>, vector<1x1x8x128xf32>
    %57 = vector.shape_cast %56 : vector<1x1x8x128xf32> to vector<8x128xf32>
    %58 = arith.mulf %29, %33 : vector<8x128xf32>
    %59 = vector.shape_cast %58 : vector<8x128xf32> to vector<1x8x128xf32>
    %cst_39 = arith.constant dense<0.000000e+00> : vector<8x128xf32>
    %60 = vector.multi_reduction <add>, %59, %cst_39 [0] : vector<1x8x128xf32> to vector<8x128xf32>
    %61 = arith.addf %57, %60 : vector<8x128xf32>
    %c0_40 = arith.constant 0 : index
    %c0_41 = arith.constant 0 : index
    %c16_42 = arith.constant 16 : index
    %c0_43 = arith.constant 0 : index
    %62 = vector.load %arg5[%c0_40, %c0_41, %c16_42, %c0_43] : memref<1x1x40x128xf32, #tpu.memory_space<vmem>>, vector<1x1x8x128xf32>
    %63 = vector.shape_cast %62 : vector<1x1x8x128xf32> to vector<8x128xf32>
    %64 = vector.shape_cast %61 : vector<8x128xf32> to vector<1x1x8x128xf32>
    tpu.vector_store %arg5[%c0_40, %c0_41, %c16_42, %c0_43], %64 {strides = array<i32>} : memref<1x1x40x128xf32, #tpu.memory_space<vmem>>, vector<1x1x8x128xf32>,
    %c0_44 = arith.constant 0 : index
    %c0_45 = arith.constant 0 : index
    %c24 = arith.constant 24 : index
    %c0_46 = arith.constant 0 : index
    %65 = vector.load %arg5[%c0_44, %c0_45, %c24, %c0_46] : memref<1x1x40x128xf32, #tpu.memory_space<vmem>>, vector<1x1x8x128xf32>
    %66 = vector.shape_cast %65 : vector<1x1x8x128xf32> to vector<8x128xf32>
    %67 = arith.mulf %29, %38 : vector<8x128xf32>
    %68 = vector.shape_cast %67 : vector<8x128xf32> to vector<1x8x128xf32>
    %cst_47 = arith.constant dense<0.000000e+00> : vector<8x128xf32>
    %69 = vector.multi_reduction <add>, %68, %cst_47 [0] : vector<1x8x128xf32> to vector<8x128xf32>
    %70 = arith.addf %66, %69 : vector<8x128xf32>
    %c0_48 = arith.constant 0 : index
    %c0_49 = arith.constant 0 : index
    %c24_50 = arith.constant 24 : index
    %c0_51 = arith.constant 0 : index
    %71 = vector.load %arg5[%c0_48, %c0_49, %c24_50, %c0_51] : memref<1x1x40x128xf32, #tpu.memory_space<vmem>>, vector<1x1x8x128xf32>
    %72 = vector.shape_cast %71 : vector<1x1x8x128xf32> to vector<8x128xf32>
    %73 = vector.shape_cast %70 : vector<8x128xf32> to vector<1x1x8x128xf32>
    tpu.vector_store %arg5[%c0_48, %c0_49, %c24_50, %c0_51], %73 {strides = array<i32>} : memref<1x1x40x128xf32, #tpu.memory_space<vmem>>, vector<1x1x8x128xf32>,
    %c0_52 = arith.constant 0 : index
    %c0_53 = arith.constant 0 : index
    %c32 = arith.constant 32 : index
    %c0_54 = arith.constant 0 : index
    %74 = vector.load %arg5[%c0_52, %c0_53, %c32, %c0_54] : memref<1x1x40x128xf32, #tpu.memory_space<vmem>>, vector<1x1x8x128xf32>
    %75 = vector.shape_cast %74 : vector<1x1x8x128xf32> to vector<8x128xf32>
    %76 = vector.shape_cast %16 : vector<8x128xf32> to vector<1x8x128xf32>
    %cst_55 = arith.constant dense<0.000000e+00> : vector<8x128xf32>
    %77 = vector.multi_reduction <add>, %76, %cst_55 [0] : vector<1x8x128xf32> to vector<8x128xf32>
    %78 = arith.addf %75, %77 : vector<8x128xf32>
    %c0_56 = arith.constant 0 : index
    %c0_57 = arith.constant 0 : index
    %c32_58 = arith.constant 32 : index
    %c0_59 = arith.constant 0 : index
    %79 = vector.load %arg5[%c0_56, %c0_57, %c32_58, %c0_59] : memref<1x1x40x128xf32, #tpu.memory_space<vmem>>, vector<1x1x8x128xf32>
    %80 = vector.shape_cast %79 : vector<1x1x8x128xf32> to vector<8x128xf32>
    %81 = vector.shape_cast %78 : vector<8x128xf32> to vector<1x1x8x128xf32>
    tpu.vector_store %arg5[%c0_56, %c0_57, %c32_58, %c0_59], %81 {strides = array<i32>} : memref<1x1x40x128xf32, #tpu.memory_space<vmem>>, vector<1x1x8x128xf32>,
    return
  }
  func.func @transform_0(%arg0: i32, %arg1: i32, %arg2: i32) -> (i32, i32, i32, i32) {
    %c1_i32 = arith.constant 1 : i32
    %0 = arith.muli %arg0, %c1_i32 : i32
    %1 = arith.addi %0, %arg2 : i32
    %c0_i32 = arith.constant 0 : i32
    %c0_i32_0 = arith.constant 0 : i32
    %c0_i32_1 = arith.constant 0 : i32
    return %arg1, %c0_i32, %1, %c0_i32_0 : i32, i32, i32, i32
  }
  func.func @transform_1(%arg0: i32, %arg1: i32, %arg2: i32) -> (i32, i32, i32) {
    %c1_i32 = arith.constant 1 : i32
    %0 = arith.muli %arg0, %c1_i32 : i32
    %1 = arith.addi %0, %arg2 : i32
    %c0_i32 = arith.constant 0 : i32
    %c0_i32_0 = arith.constant 0 : i32
    return %arg1, %1, %c0_i32 : i32, i32, i32
  }
  func.func @transform_2(%arg0: i32, %arg1: i32, %arg2: i32) -> (i32, i32, i32, i32) {
    %c0_i32 = arith.constant 0 : i32
    %c0_i32_0 = arith.constant 0 : i32
    %c0_i32_1 = arith.constant 0 : i32
    return %arg0, %arg1, %c0_i32, %c0_i32_0 : i32, i32, i32, i32
  }
}

</mosaic_0001>

<bundles_post_ra>
// kernel: tpu_custom_call.1
= control target key start
LH: loop header
LB: loop body
LE: loop exit
PB: predicated region body
PF: predicated region fallthrough
CT: control target
= control target key end

     0   :  { %7 = vsyncpa [#allocation3], 0  ;;  %s903_s0 = inlined_call_operand.hbm [shape: f32[2,3,8,128], index: 0, kind: input, shape index: {}]   ;;  %s904_s1 = inlined_call_operand.hbm [shape: s32[2,8,128], index: 1, kind: input, shape index: {}]   ;;  %s905_s2 = inlined_call_operand.hbm [shape: f32[1,2,40,128], index: 2, kind: output, shape index: {}]  }
   0x1   :  { %9 = vsyncpa [#allocation3 + $0x1], 0 }
   0x2   :  { %10 = vsyncpa [#allocation6], 0 }
   0x3   :  { %12 = vsyncpa [#allocation6 + $0x1], 0 }
   0x4   :  { %13 = vsyncpa [#allocation4], 0 }
   0x5   :  { %15 = vsyncpa [#allocation4 + $0x1], 0  ;;  %s685_s9 = smov 0   ;;  %s687_s10 = smov 0  }
   0x6   :  { %s689_s11 = smov 0   ;;  %s691_s12 = smov 0  }
   0x7   :  { %s693_s13 = smov 0   ;;  %s695_s14 = smov 0  }
   0x8 LB: > { %s422_s15 = sadd.s32 4294967295, %s660_s14   ;;  %s423_s16 = sadd.s32 4294967294, %s660_s14   ;;  %s660_s14 = sphi %s695_s14, %s21_s14   ;;  %s656_s13 = sphi %s693_s13, %s924_s13   ;;  %s652_s12 = sphi %s691_s12, %s923_s12   ;;  %s648_s11 = sphi %s689_s11, %s922_s11   ;;  %s644_s10 = sphi %s687_s10, %s921_s10   ;;  %s640_s9 = sphi %s685_s9, %s920_s9  }
   0x9   : > { %s36_s17 = sadd.s32 1, %s656_s13  ;;  %s51_s18 = sadd.s32 1, %s648_s11 }
   0xa   : > { %p38_p0 = scmp.ge.s32.totalorder %s36_s17, 2  ;;  %p58_p1 = scmp.ne.s32.totalorder %s648_s11, %s644_s10 }
   0xb   : > { %p59_p2 = scmp.eq.s32.totalorder %s660_s14, 0  ;;  %p64_p3 = scmp.ne.s32.totalorder %s644_s10, %s640_s9 }
   0xc   : > { %s926_s17 = smov (%p38_p0, %s36_s17), 0  ;;  %p65_p5 = scmp.eq.s32.totalorder %s422_s15, 0 }
   0xd   : > { %p726_p4 = por %p59_p2, %p58_p1  ;;  %s46_s20 = ssub.s32 %s656_s13, %s926_s17 }
   0xe   : > { %p120_p6 = scmp.eq.s32.totalorder %s422_s15, 1  ;;  %p49_p7 = scmp.eq.s32.totalorder %s46_s20, 0 }
   0xf   : > { %p732_p8 = por %p65_p5, %p64_p3  ;;  %p126_p10 = scmp.eq.s32.totalorder %s423_s16, 1 }
  0x10   : > { %p736_p9 = por %p120_p6, %p58_p1  ;;  %p459_p13 = scmp.lt.s32.totalorder %s660_s14, 2 }
  0x11   : > { %s909_s21 = scalar_select %p732_p8, 1, 0 }
  0x12   : > { %s910_s22 = scalar_select %p736_p9, 1, 0 }
  0x13   : > { %s741_s23 = scalar_select %p49_p7, %s648_s11, %s51_s18  }
  0x14   : > { %p743_p11 = por %p126_p10, %p64_p3  ;;  %s750_s25 = sand.u32 1, %s648_s11  }
  0x15   : > { %s437_s26 = smul.u32 24, %s750_s25  ;;  %p756_p0 = pnand %p459_p13, %p726_p4 }
  0x16   : > { %s911_s24 = scalar_select %p743_p11, 1, 0 }
  0x17   : > { %s438_s27 = smul.u32 384, %s656_s13  ;;  %s150_s4 = scalar_lea.vmem [#allocation2], %s437_s26 }
  0x18   : > { %s159_s5 = sshll.u32 %s150_s4, 4  ;;  %s147_s6 = scalar_lea.sflag [#allocation3], %s750_s25  ;;  %s765_s5 = int_to_ptr.vmem [resolvable:$true] %s159_s5 }
  0x19   : > { %s763_s3 = scalar_lea.hbm %s903_s0, %s438_s27  ;;  %p516_p3 = pneg %p756_p0 }
  0x1a   : > { %s514_s7 = scalar_lea.hbm %s763_s3, 384  ;;  %s519_s16 = scalar_lea.hbm %s903_s0, 768 }
  0x1b   : > { %p515_p2 = scmp.ne.s32.totalorder %s763_s3, %s514_s7  ;;  %p520_p6 = scmp.lt.u32.totalorder %s763_s3, %s903_s0 }
  0x1c   : > { %p521_p7 = scmp.lt.u32.totalorder %s519_s16, %s514_s7  ;;  %p523_p13 = scmp.lt.u32.totalorder %s514_s7, %s763_s3 }
  0x1d   : > { %p517_p4 = pnand %p516_p3, %p515_p2 }
  0x1e   : > { %p522_p10 = por %p521_p7, %p520_p6 }
  0x1f   : > { %p518_p5 = pneg %p517_p4 }
  0x20   : > { %p524_p12 = por %p523_p13, %p522_p10 }
  0x22   : > { %p525_p1 = pnand %p524_p12, %p518_p5 }
  0x24   : > { %528 = shalt.err (!%p525_p1)
}
  0x25   : > { %s529_s20 = scalar_lea.vmem %s765_s5, 384  ;;  %s662_s26 = smov [#allocation2]  }
  0x26   : > { %p530_p2 = scmp.ne.s32.totalorder %s765_s5, %s529_s20  ;;  %s534_s27 = sshll.u32 %s662_s26, 4  ;;  %s535_s27 = int_to_ptr.vmem [resolvable:$false] %s534_s27 }
  0x27   : > { %s536_s29 = scalar_lea.vmem %s535_s27, 768  ;;  %p537_p9 = scmp.lt.s32.totalorder %s765_s5, %s535_s27 }
  0x28   : > { %p532_p4 = pnand %p530_p2, %p516_p3  ;;  %p538_p6 = scmp.lt.s32.totalorder %s536_s29, %s529_s20 }
  0x2a   : > { %p533_p11 = pneg %p532_p4  ;;  %p539_p7 = por %p538_p6, %p537_p9 }
  0x2c   : > { %p540_p10 = pnand %p539_p7, %p533_p11 }
  0x2e   : > { %543 = shalt.err (!%p540_p10)
}
  0x2f   : > { %s663_s30 = smov 128   ;;  %s664_s4 = smov 8  }
  0x30   : > { %451 = dma.hbm_to_vmem [thread:$0]  (!%p756_p0), %s763_s3, 384, %s765_s5, %s147_s6, %s663_s30, %s663_s30, %s664_s4  }
  0x31   : > { %p187_p12 = scmp.lt.s32.totalorder %s660_s14, 3  ;;  %s427_s7 = sshll.u32 %s750_s25, 3 }
  0x32   : > { %s428_s8 = sshll.u32 %s656_s13, 7  ;;  %p913_p9 = scmp.ge.s32.totalorder %s660_s14, 1 }
  0x33   : > { %s808_s19 = scalar_lea.hbm %s904_s1, %s428_s8  ;;  %s173_s20 = scalar_lea.vmem [#allocation5], %s427_s7 }
  0x34   : > { %p801_p11 = pnand %p913_p9, %p187_p12  ;;  %s182_s26 = sshll.u32 %s173_s20, 4  ;;  %s183_s26 = int_to_ptr.vmem [resolvable:$true] %s182_s26 }
  0x35   : > { %s170_s3 = scalar_lea.sflag [#allocation6], %s750_s25  ;;  %s544_s5 = scalar_lea.hbm %s808_s19, 128 }
  0x36   : > { %s914_s15 = scalar_select %p801_p11, 1, 0 }
  0x37   : > { %p545_p1 = scmp.ne.s32.totalorder %s808_s19, %s544_s5  ;;  %s549_s29 = scalar_lea.hbm %s904_s1, 256 }
  0x38   : > { %p550_p2 = scmp.lt.u32.totalorder %s808_s19, %s904_s1  ;;  %p551_p4 = scmp.lt.u32.totalorder %s549_s29, %s544_s5 }
  0x39   : > { %p547_p5 = pnand %p545_p1, %p516_p3  ;;  %p553_p7 = scmp.lt.u32.totalorder %s544_s5, %s808_s19 }
  0x3a   : > { %p552_p6 = por %p551_p4, %p550_p2 }
  0x3b   : > { %p548_p13 = pneg %p547_p5 }
  0x3c   : > { %p554_p10 = por %p553_p7, %p552_p6 }
  0x3e   : > { %p555_p12 = pnand %p554_p10, %p548_p13 }
  0x40   : > { %558 = shalt.err (!%p555_p12)
}
  0x41   : > { %s559_s25 = scalar_lea.vmem %s183_s26, 128  ;;  %s665_s7 = smov [#allocation5]  }
  0x42   : > { %p560_p9 = scmp.ne.s32.totalorder %s183_s26, %s559_s25  ;;  %s564_s8 = sshll.u32 %s665_s7, 4  ;;  %s565_s8 = int_to_ptr.vmem [resolvable:$false] %s564_s8 }
  0x43   : > { %s566_s16 = scalar_lea.vmem %s565_s8, 256  ;;  %p567_p8 = scmp.lt.s32.totalorder %s183_s26, %s565_s8 }
  0x44   : > { %p562_p1 = pnand %p560_p9, %p516_p3  ;;  %p568_p11 = scmp.lt.s32.totalorder %s566_s16, %s559_s25 }
  0x46   : > { %p563_p5 = pneg %p562_p1  ;;  %p569_p2 = por %p568_p11, %p567_p8 }
  0x48   : > { %p570_p4 = pnand %p569_p2, %p563_p5 }
  0x4a   : > { %573 = shalt.err (!%p570_p4)
}
  0x4b   : > { %454 = dma.hbm_to_vmem [thread:$0]  (!%p756_p0), %s808_s19, 128, %s183_s26, %s170_s3  }
  0x4c   : > { %p915_p13 = scmp.ne.s32.totalorder %s914_s15, 0 }
  0x4d   : > { %s833_s18 = sand.u32 (!%p915_p13), 1, %s644_s10   ;;  %p916_p3 = scmp.ne.s32.totalorder (!%p915_p13), %s909_s21, 0 }
  0x4e   : > { %191 = sbr.rel (%p915_p13) target bundleno = 116 (0x74), region = 28  ;;  %s194_s5 = scalar_lea.sflag (!%p915_p13), [#allocation3], %s833_s18 }
  0x4f   : > { %s439_s20 = smul.u32 (!%p915_p13), 24, %s833_s18 }
  0x51   : > { %s197_s6 = scalar_lea.vmem (!%p915_p13), [#allocation2], %s439_s20 }
  0x55   : > { %627 = dma.done.wait (%p916_p3), %s194_s5, 384  }
  0x56   : > { %629 = vsyncadd (%p916_p3), %s194_s5, 4294966912  ;;  %s430_s28 = sshll.u32 %s833_s18, 3  ;;  %s203_s15 = scalar_lea.sflag [#allocation6], %s833_s18 }
  0x57   : > { %s206_s19 = scalar_lea.vmem [#allocation5], %s430_s28 }
  0x58   : > { %631 = dma.done.wait (%p916_p3), %s203_s15, 128  }
  0x59   : > { %633 = vsyncadd (%p916_p3), %s203_s15, 4294967168  ;;  %s440_s26 = smul.u32 40, %s833_s18  ;;  %v248_v0 = vld [vmem:[%s206_s19] sm:$0xff]  ;;  %v431_v2 = vld [vmem:[%s197_s6 + $0x8] sm:$0xff]  ;;  %v666_v5 = vmov 0.0   ;;  %s292_s25 = scalar_lea.sflag [#allocation4], %s833_s18 }
  0x5a   : > { %v243_v1 = vld [vmem:[%s197_s6] sm:$0xff]  ;;  %vm249_vm0 = vcmp.eq.s32.totalorder %v248_v0, 1  ;;  %vm250_vm1 = vcmp.eq.s32.totalorder %v248_v0, 2  ;;  %vm253_vm2 = vcmp.eq.s32.totalorder %v248_v0, 0  ;;  %v432_v3 = vld [vmem:[%s197_s6 + $0x10] sm:$0xff]  ;;  %v264_v14 = vmul.f32 %v431_v2, %v431_v2  ;;  %s441_s3 = smul.u32 640, %s652_s12 }
  0x5b   : > { %v261_v4 = vadd.f32 %v431_v2, %v243_v1  ;;  %v254_v6 = vsel %vm253_vm2, 1.0, %v666_v5  ;;  %v255_v7 = vsel %vm249_vm0, 5.0, %v666_v5  ;;  %v257_v8 = vsel %vm250_vm1, 50.0, %v666_v5  ;;  %s231_s21 = scalar_lea.vmem [#allocation7], %s440_s26  ;;  %p917_p0 = scmp.ne.s32.totalorder %s910_s22, 0 }
  0x5c   : > { %v259_v9 = vsel %vm249_vm0, %v431_v2, %v243_v1  ;;  %v256_v10 = vadd.f32 %v255_v7, %v254_v6  ;;  %v263_v12 = vmul.f32 %v243_v1, %v243_v1  ;;  %v266_v15 = vmul.f32 %v432_v3, %v432_v3  ;;  %s307_s27 = sshll.u32 %s231_s21, 4  ;;  %s852_s4 = scalar_lea.hbm %s905_s2, %s441_s3  ;;  %s854_s27 = int_to_ptr.vmem [resolvable:$true] %s307_s27 }
  0x5d   : > { %v262_v11 = vadd.f32 %v432_v3, %v261_v4  ;;  %v260_v13 = vsel %vm250_vm1, %v432_v3, %v259_v9  ;;  %v433_v16 = vsel %vm250_vm1, 1.0, %v666_v5  ;;  %s574_s7 = scalar_lea.vmem %s854_s27, 640  ;;  %s667_s12 = smov [#allocation7]  }
  0x5e   : > { %v258_v17 = vadd.f32 %v257_v8, %v256_v10  ;;  %v265_v18 = vadd.f32 %v264_v14, %v263_v12  ;;  %290 = vst [vmem:[%s231_s21 + $0x20] sm:$0xff] %v433_v16  ;;  %p575_p8 = scmp.ne.s32.totalorder %s854_s27, %s574_s7  ;;  %s578_s8 = sshll.u32 %s667_s12, 4  ;;  %s579_s8 = int_to_ptr.vmem [resolvable:$false] %s578_s8 }
  0x5f   : > { %s580_s16 = scalar_lea.vmem %s579_s8, 1280  ;;  %p581_p7 = scmp.lt.s32.totalorder %s854_s27, %s579_s8 }
  0x60   : > { %v273_v19 = vmul.f32 %v260_v13, %v258_v17  ;;  %v278_v20 = vmul.f32 %v262_v11, %v258_v17  ;;  %v267_v21 = vadd.f32 %v266_v15, %v265_v18  ;;  %271 = vst [vmem:[%s231_s21] sm:$0xff] %v258_v17  ;;  %p576_p11 = pnand %p575_p8, %p917_p0  ;;  %p582_p10 = scmp.lt.s32.totalorder %s580_s16, %s574_s7 }
  0x62   : > { %v283_v22 = vmul.f32 %v267_v21, %v258_v17  ;;  %276 = vst [vmem:[%s231_s21 + $0x8] sm:$0xff] %v273_v19  ;;  %281 = vst [vmem:[%s231_s21 + $0x10] sm:$0xff] %v278_v20  ;;  %p577_p6 = pneg %p576_p11  ;;  %p583_p12 = por %p582_p10, %p581_p7 }
  0x64   : > { %286 = vst [vmem:[%s231_s21 + $0x18] sm:$0xff] %v283_v22  ;;  %p584_p9 = pnand %p583_p12, %p577_p6 }
  0x66   : > { %587 = shalt.err (!%p584_p9)
}
  0x67   : > { %s588_s20 = scalar_lea.hbm %s852_s4, 640  ;;  %s592_s28 = scalar_lea.hbm %s905_s2, 1280 }
  0x68   : > { %p589_p1 = scmp.ne.s32.totalorder %s852_s4, %s588_s20  ;;  %p593_p4 = scmp.lt.u32.totalorder %s852_s4, %s905_s2 }
  0x69   : > { %p594_p13 = scmp.lt.u32.totalorder %s592_s28, %s588_s20  ;;  %p596_p8 = scmp.lt.u32.totalorder %s588_s20, %s852_s4 }
  0x6a   : > { %p590_p5 = pnand %p589_p1, %p917_p0 }
  0x6b   : > { %p595_p3 = por %p594_p13, %p593_p4 }
  0x6c   : > { %p591_p2 = pneg %p590_p5 }
  0x6d   : > { %p597_p11 = por %p596_p8, %p595_p3 }
  0x6f   : > { %p598_p6 = pnand %p597_p11, %p591_p2 }
  0x71   : > { %601 = shalt.err (!%p598_p6)
}
  0x72   : > { %s668_s26 = smov 128   ;;  %s669_s21 = smov 8  }
  0x73   : > { %446 = dma.vmem_to_hbm [thread:$0]  (%p917_p0), %s854_s27, 640, %s852_s4, %s292_s25, %s668_s26, %s668_s26, %s669_s21  }
  0x74 PF: > { %s322_s3 = sand.u32 1, %s640_s9   ;;  %p918_p7 = scmp.ne.s32.totalorder %s911_s24, 0 }
  0x75   : > { %p919_p10 = scmp.ge.s32.totalorder %s660_s14, 2  ;;  %s323_s29 = scalar_lea.sflag [#allocation4], %s322_s3 }
  0x77   : > { %p456_p12 = pnand %p919_p10, %p918_p7 }
  0x79   : > { %635 = dma.done.wait (!%p456_p12), %s323_s29, 640  }
  0x7a   : > { %637 = vsyncadd (!%p456_p12), %s323_s29, 4294966656  ;;  %s21_s14 = sadd.s32 1, %s660_s14   ;;  %s920_s9 = smov %s644_s10 }
  0x7b   : > { %p18_p9 = scmp.ge.s32.totalorder %s21_s14, 4   ;;  %s921_s10 = smov %s648_s11 }
  0x7c   : > { %s922_s11 = smov %s741_s23  ;;  %s923_s12 = smov %s656_s13 }
  0x7d   : > { %s924_s13 = smov %s926_s17  ;;  %20 = sbr.rel (!%p18_p9) target bundleno = 8 (0x8), region = 92 }
  0x84   :  { %328 = vsyncpa [#allocation3], 1 }
  0x85   :  { %330 = vsyncpa [#allocation3 + $0x1], 1 }
  0x86   :  { %331 = vsyncpa [#allocation6], 1 }
  0x87   :  { %333 = vsyncpa [#allocation6 + $0x1], 1 }
  0x88   :  { %334 = vsyncpa [#allocation4], 1 }
  0x89   :  { %336 = vsyncpa [#allocation4 + $0x1], 1 }

</bundles_post_ra>
